<compile_context>
chip_gen: v5e
topology: v5e:2x2
jax: 0.10.0
libtpu: 0.0.40
codegen_flags: <defaults>
</compile_context>

<pallas_src>
import functools

import jax
import jax.numpy as jnp
from jax.experimental import pallas as pl
from jax.experimental.pallas import tpu as pltpu


def _round_up(v, m):
    return (v + m - 1) // m * m


def _vmem_capacity_bytes():
    try:
        info = pltpu.get_tpu_info()
        return int(getattr(info, "vmem_capacity_bytes"))
    except Exception:
        return 64 * 1024 * 1024   # conservative (v7x-sized) default


def _pick_tiles(B, HW, C, *, itemsize, budget):
    """Pick (batch_tile, spatial_tile).

    Batch tile divides B and is a multiple of 8 (or == B) so the (tb, ncp)
    output block is legal; spatial tile divides HW and is a multiple of 128
    (or == HW) so the (C, thw) trailing dims of the x block are legal.  Keeps
    >= 2 batch-tile grid steps when B >= 16 (megacore sharding on v7x) and one
    x block within `budget` bytes when possible; always returns a legal
    (smallest) tile as a graceful fallback.
    """
    max_tb = B if B < 16 else max(1, B // 2)
    tb_cands = [t for t in range(min(max_tb, 64), 0, -1)
                if B % t == 0 and (t == B or t % 8 == 0)]
    if not tb_cands:
        tb_cands = [B]                       # full-dim block is always legal
    thw_cands = [HW] + [t for t in range((HW // 128) * 128, 0, -128)
                        if t != HW and HW % t == 0]
    for tb in tb_cands:
        for thw in thw_cands:
            if tb * C * thw * itemsize <= budget:
                return tb, thw
    return tb_cands[-1], thw_cands[-1]       # smallest legal tile


def _gem_fc_kernel_intp(x_ref, w_ref, b_ref, o_ref, acc_ref, *,
                        eps, inv_hw, p_int, compute_dtype):
    # x_ref:   VMEM (TB, C, THW)  -- NCHW-flattened tile, spatial on lanes
    # w_ref:   VMEM (C, NCp)      -- fc weight, transposed + zero-padded
    # b_ref:   VMEM (1, NCp)      -- fc bias, zero-padded, f32
    # o_ref:   VMEM (TB, NCp)
    # acc_ref: VMEM (TB, C) f32   -- running sum of x**p over spatial
    k = pl.program_id(1)

    @pl.when(k == 0)
    def _():
        acc_ref[...] = jnp.zeros_like(acc_ref)

    x = jnp.maximum(x_ref[...].astype(compute_dtype), eps)   # clamp(min=eps)
    xp = x
    for _ in range(p_int - 1):       # x**p via VPU multiplies (no EUP work)
        xp = xp * x
    acc_ref[...] += jnp.sum(xp.astype(jnp.float32), axis=-1)  # XLU lane reduce

    @pl.when(k == pl.num_programs(1) - 1)
    def _():
        mean = acc_ref[...] * inv_hw
        pooled = jnp.exp((1.0 / p_int) * jnp.log(mean))        # only (TB, C)
        o_ref[...] = (
            jnp.dot(pooled.astype(w_ref.dtype), w_ref[...],
                    preferred_element_type=jnp.float32)
            + b_ref[...]
        )


def _gem_fc_kernel_general(p_ref, x_ref, w_ref, b_ref, o_ref, acc_ref, *,
                           eps, inv_hw, compute_dtype):
    # p_ref: SMEM (1, 1) f32 -- trainable GeM exponent; rest as in intp kernel.
    k = pl.program_id(1)

    @pl.when(k == 0)
    def _():
        acc_ref[...] = jnp.zeros_like(acc_ref)

    p = p_ref[0, 0]
    x = jnp.maximum(x_ref[...].astype(compute_dtype), eps)
    xp = jnp.exp(p.astype(compute_dtype) * jnp.log(x))        # x ** p, x > 0
    acc_ref[...] += jnp.sum(xp.astype(jnp.float32), axis=-1)

    @pl.when(k == pl.num_programs(1) - 1)
    def _():
        mean = acc_ref[...] * inv_hw
        pooled = jnp.exp(jnp.log(mean) / p)
        o_ref[...] = (
            jnp.dot(pooled.astype(w_ref.dtype), w_ref[...],
                    preferred_element_type=jnp.float32)
            + b_ref[...]
        )


def prepare_global_head_params(fc_weight, fc_bias, *, weight_dtype=None):
    """One-time (parameter-load-time) prep: transpose fc weight to (C, NCp),
    zero-pad the output dim to a multiple of 128 (lane-dense store / full MXU
    N tile) and pad the bias.  Do NOT call this per forward step."""
    nc, C = fc_weight.shape
    ncp = _round_up(nc, 128)
    wdt = weight_dtype if weight_dtype is not None else fc_weight.dtype
    w = jnp.zeros((C, ncp), wdt).at[:, :nc].set(fc_weight.astype(wdt).T)
    b = jnp.zeros((1, ncp), jnp.float32).at[0, :nc].set(
        fc_bias.astype(jnp.float32))
    return w, b, nc


def global_head_forward(x_nchw, p, w_padded, b_padded, nc, *,
                        eps=1e-6, compute_dtype=None):
    """GlobalHead.forward (GeM pool with output_size=1, then Linear).

    x_nchw: (B, C, H, W) activations (f32 or bf16); p: GeM exponent -- a static
    Python int/integer-float selects the EUP-free multiply fast path, a jnp
    scalar (trainable parameter) uses the general exp(p*log x) path.
    Returns (B, nc) float32.
    """
    B, C, H, W = x_nchw.shape
    HW = H * W
    ncp = w_padded.shape[1]
    assert w_padded.shape[0] == C

    x = x_nchw.reshape(B, C, HW)       # free reshape -- no transpose, no copy
    cdt = jnp.dtype(compute_dtype) if compute_dtype is not None else x.dtype

    # Static integer exponent? -> repeated-multiply fast path.
    p_int = None
    if isinstance(p, (int, float)) and not isinstance(p, bool):
        if float(p) == int(p) and int(p) >= 1:
            p_int = int(p)

    # Generation-aware VMEM budgeting (v7x: 64 MiB VMEM, v5e/v6e: 128 MiB).
    vmem_cap = _vmem_capacity_bytes()
    small_vmem = vmem_cap < 100 * 1024 * 1024
    x_budget = (4 if small_vmem else 12) * 1024 * 1024
    vmem_cap_limit = (40 if small_vmem else 64) * 1024 * 1024

    tb, thw = _pick_tiles(B, HW, C, itemsize=x.dtype.itemsize, budget=x_budget)
    grid = (B // tb, HW // thw)

    # VMEM estimate: double-buffered x blocks + resident w/b (counted twice:
    # they keep the default 2 buffers; single-buffering via
    # pipeline_mode=pl.Buffered(1) would free C*ncp bytes of headroom) +
    # double-buffered output blocks + accumulator scratch + slack.
    x_blk_bytes = tb * C * thw * x.dtype.itemsize
    vmem_est = (2 * x_blk_bytes
                + 2 * C * ncp * w_padded.dtype.itemsize
                + 2 * ncp * 4
                + 2 * tb * ncp * 4
                + tb * C * 4
                + (2 << 20))
    vmem_limit = int(min(vmem_cap_limit, max(32 * 1024 * 1024, vmem_est)))

    if p_int is not None:
        flops = B * HW * C * max(p_int - 1, 0) + 2 * B * C * ncp
        transcendentals = 2 * B * C
    else:
        flops = 2 * B * HW * C + 2 * B * C * ncp
        transcendentals = 2 * B * HW * C + 2 * B * C
    cost = pl.CostEstimate(
        flops=flops,
        transcendentals=transcendentals,
        bytes_accessed=(x.size * x.dtype.itemsize
                        + w_padded.size * w_padded.dtype.itemsize
                        + ncp * 4 + B * ncp * 4),
    )

    x_spec = pl.BlockSpec((tb, C, thw), lambda i, k: (i, 0, k))
    w_spec = pl.BlockSpec((C, ncp), lambda i, k: (0, 0))   # VMEM-resident
    b_spec = pl.BlockSpec((1, ncp), lambda i, k: (0, 0))   # VMEM-resident
    o_spec = pl.BlockSpec((tb, ncp), lambda i, k: (i, 0))
    scratch = [pltpu.VMEM((tb, C), jnp.float32)]
    cparams = pltpu.CompilerParams(
        dimension_semantics=("parallel", "arbitrary"),
        vmem_limit_bytes=vmem_limit,
    )
    out_shape = jax.ShapeDtypeStruct((B, ncp), jnp.float32)

    if p_int is not None:
        kernel = functools.partial(_gem_fc_kernel_intp, eps=eps,
                                   inv_hw=1.0 / HW, p_int=p_int,
                                   compute_dtype=cdt)
        out = pl.pallas_call(
            kernel,
            out_shape=out_shape,
            grid_spec=pltpu.PrefetchScalarGridSpec(
                num_scalar_prefetch=0,
                grid=grid,
                in_specs=[x_spec, w_spec, b_spec],
                out_specs=o_spec,
                scratch_shapes=scratch),
            compiler_params=cparams,
            cost_estimate=cost,
        )(x, w_padded, b_padded)
    else:
        p_arr = jnp.asarray(p, jnp.float32).reshape(1, 1)
        kernel = functools.partial(_gem_fc_kernel_general, eps=eps,
                                   inv_hw=1.0 / HW, compute_dtype=cdt)
        out = pl.pallas_call(
            kernel,
            out_shape=out_shape,
            grid_spec=pltpu.PrefetchScalarGridSpec(
                num_scalar_prefetch=0,
                grid=grid,
                in_specs=[pl.BlockSpec(memory_space=pltpu.MemorySpace.SMEM),
                          x_spec, w_spec, b_spec],
                out_specs=o_spec,
                scratch_shapes=scratch),
            compiler_params=cparams,
            cost_estimate=cost,
        )(p_arr, x, w_padded, b_padded)

    return out[:, :nc]


def _reference(x_nchw, p, fc_weight, fc_bias, eps=1e-6):
    """Pure-JAX reference mirroring the PyTorch forward."""
    xc = jnp.maximum(x_nchw.astype(jnp.float32), eps)
    pooled = jnp.mean(xc ** p, axis=(2, 3)) ** (1.0 / p)        # (B, C)
    return pooled @ fc_weight.astype(jnp.float32).T + fc_bias.astype(jnp.float32)


if __name__ == "__main__":
    # Small shapes consistent with GlobalHead(w_in=C, nc=8, pp=3) on NCHW input.
    B, C, H, W = 2, 4, 16, 16
    NC = 8
    PP = 3.0

    key = jax.random.PRNGKey(0)
    kx, kw, kb = jax.random.split(key, 3)

    x = jax.random.uniform(kx, (B, C, H, W), dtype=jnp.float32)   # activations
    p_param = jnp.ones((1,), jnp.float32) * PP                    # trainable p
    fc_weight = jax.random.normal(kw, (NC, C), dtype=jnp.float32) * 0.1
    fc_bias = jax.random.normal(kb, (NC,), dtype=jnp.float32) * 0.1

    # One-time parameter prep (load time, not per forward call).
    w_pad, b_pad, nc = prepare_global_head_params(fc_weight, fc_bias)

    ref = _reference(x, PP, fc_weight, fc_bias)

    # 1) Static integer p (GeM default p=3): VPU multiply fast path.
    out_fast = global_head_forward(x, 3, w_pad, b_pad, nc)
    out_fast = jax.block_until_ready(out_fast)
    assert out_fast.shape == (B, NC)
    assert jnp.allclose(out_fast, ref, atol=1e-4, rtol=1e-4), (out_fast, ref)

    # 2) Trainable (dynamic) p: general exp(p*log x) path via SMEM scalar.
    out_gen = global_head_forward(x, p_param[0], w_pad, b_pad, nc)
    out_gen = jax.block_until_ready(out_gen)
    assert out_gen.shape == (B, NC)
    assert jnp.allclose(out_gen, ref, atol=5e-4, rtol=5e-4), (out_gen, ref)

    print("KERNEL_OK")
</pallas_src>

<mosaic_0001>
module attributes {stable_mosaic.version = 11 : i64} {
  func.func @_gem_fc_kernel_intp(%arg0: i32, %arg1: i32, %arg2: memref<2x4x256xf32, #tpu.memory_space<vmem>>, %arg3: memref<4x128xf32, #tpu.memory_space<vmem>>, %arg4: memref<1x128xf32, #tpu.memory_space<vmem>>, %arg5: memref<2x128xf32, #tpu.memory_space<vmem>>, %arg6: memref<2x4xf32, #tpu.memory_space<vmem>>) attributes {dimension_semantics = [#tpu.dimension_semantics<parallel>, #tpu.dimension_semantics<arbitrary>], iteration_bounds = array<i64: 1, 1>, scalar_prefetch = 0 : i64, scratch_operands = 1 : i64, tpu.core_type = #tpu.core_type<tc>, window_params = [{transform_indices = @transform_0, window_bounds = array<i64: 2, 4, 256>}, {pipeline_mode = #tpu.pipeline_mode<synchronous>, transform_indices = @transform_1, window_bounds = array<i64: 4, 128>}, {pipeline_mode = #tpu.pipeline_mode<synchronous>, transform_indices = @transform_2, window_bounds = array<i64: 1, 128>}, {transform_indices = @transform_3, window_bounds = array<i64: 2, 128>}]} {
    %c0_i32 = arith.constant 0 : i32
    %0 = arith.cmpi eq, %arg1, %c0_i32 : i32
    %1 = arith.extui %0 : i1 to i32
    %c0_i32_0 = arith.constant 0 : i32
    %2 = arith.cmpi ne, %1, %c0_i32_0 : i32
    scf.if %2 {
      %cst_10 = arith.constant 0.000000e+00 : f32
      %15 = vector.broadcast %cst_10 : f32 to vector<2x4xf32>
      %c0_11 = arith.constant 0 : index
      %c0_12 = arith.constant 0 : index
      %16 = vector.load %arg6[%c0_11, %c0_12] : memref<2x4xf32, #tpu.memory_space<vmem>>, vector<2x4xf32>
      tpu.vector_store %arg6[%c0_11, %c0_12], %15 {strides = array<i32>} : memref<2x4xf32, #tpu.memory_space<vmem>>, vector<2x4xf32>,
    } else {
    }
    %c0 = arith.constant 0 : index
    %c0_1 = arith.constant 0 : index
    %c0_2 = arith.constant 0 : index
    %3 = vector.load %arg2[%c0, %c0_1, %c0_2] : memref<2x4x256xf32, #tpu.memory_space<vmem>>, vector<2x4x256xf32>
    %cst = arith.constant 9.99999997E-7 : f32
    %4 = vector.broadcast %cst : f32 to vector<2x4x256xf32>
    %5 = arith.maximumf %3, %4 : vector<2x4x256xf32>
    %6 = arith.mulf %5, %5 : vector<2x4x256xf32>
    %7 = arith.mulf %6, %5 : vector<2x4x256xf32>
    %c0_3 = arith.constant 0 : index
    %c0_4 = arith.constant 0 : index
    %8 = vector.load %arg6[%c0_3, %c0_4] : memref<2x4xf32, #tpu.memory_space<vmem>>, vector<2x4xf32>
    %cst_5 = arith.constant dense<0.000000e+00> : vector<2x4xf32>
    %9 = vector.multi_reduction <add>, %7, %cst_5 [2] : vector<2x4x256xf32> to vector<2x4xf32>
    %10 = arith.addf %8, %9 : vector<2x4xf32>
    %c0_6 = arith.constant 0 : index
    %c0_7 = arith.constant 0 : index
    %11 = vector.load %arg6[%c0_6, %c0_7] : memref<2x4xf32, #tpu.memory_space<vmem>>, vector<2x4xf32>
    tpu.vector_store %arg6[%c0_6, %c0_7], %10 {strides = array<i32>} : memref<2x4xf32, #tpu.memory_space<vmem>>, vector<2x4xf32>,
    %c0_i32_8 = arith.constant 0 : i32
    %12 = arith.cmpi eq, %arg1, %c0_i32_8 : i32
    %13 = arith.extui %12 : i1 to i32
    %c0_i32_9 = arith.constant 0 : i32
    %14 = arith.cmpi ne, %13, %c0_i32_9 : i32
    scf.if %14 {
      %c0_10 = arith.constant 0 : index
      %c0_11 = arith.constant 0 : index
      %15 = vector.load %arg6[%c0_10, %c0_11] : memref<2x4xf32, #tpu.memory_space<vmem>>, vector<2x4xf32>
      %cst_12 = arith.constant 3.906250e-03 : f32
      %16 = vector.broadcast %cst_12 : f32 to vector<2x4xf32>
      %17 = arith.mulf %15, %16 : vector<2x4xf32>
      %18 = math.log %17 : vector<2x4xf32>
      %cst_13 = arith.constant 0.333333343 : f32
      %19 = vector.broadcast %cst_13 : f32 to vector<2x4xf32>
      %20 = arith.mulf %19, %18 : vector<2x4xf32>
      %21 = math.exp %20 : vector<2x4xf32>
      %c0_14 = arith.constant 0 : index
      %c0_15 = arith.constant 0 : index
      %22 = vector.load %arg3[%c0_14, %c0_15] : memref<4x128xf32, #tpu.memory_space<vmem>>, vector<4x128xf32>
      %cst_16 = arith.constant dense<0.000000e+00> : vector<2x128xf32>
      %23 = tpu.matmul %21, %22, %cst_16 {dimension_numbers = #tpu.dot_dimension_numbers<[1], [0], [0], [1], [0, 0, 1, 1], [], []>} : vector<2x4xf32>, vector<4x128xf32>, vector<2x128xf32> -> vector<2x128xf32>
      %c0_17 = arith.constant 0 : index
      %c0_18 = arith.constant 0 : index
      %24 = vector.load %arg4[%c0_17, %c0_18] : memref<1x128xf32, #tpu.memory_space<vmem>>, vector<1x128xf32>
      %25 = vector.broadcast %24 : vector<1x128xf32> to vector<2x128xf32>
      %26 = arith.addf %23, %25 : vector<2x128xf32>
      %c0_19 = arith.constant 0 : index
      %c0_20 = arith.constant 0 : index
      %27 = vector.load %arg5[%c0_19, %c0_20] : memref<2x128xf32, #tpu.memory_space<vmem>>, vector<2x128xf32>
      tpu.vector_store %arg5[%c0_19, %c0_20], %26 {strides = array<i32>} : memref<2x128xf32, #tpu.memory_space<vmem>>, vector<2x128xf32>,
    } else {
    }
    return
  }
  func.func @transform_0(%arg0: i32, %arg1: i32) -> (i32, i32, i32) {
    %c0_i32 = arith.constant 0 : i32
    %c0_i32_0 = arith.constant 0 : i32
    return %arg0, %c0_i32, %arg1 : i32, i32, i32
  }
  func.func @transform_1(%arg0: i32, %arg1: i32) -> (i32, i32) {
    %c0_i32 = arith.constant 0 : i32
    %c0_i32_0 = arith.constant 0 : i32
    %c0_i32_1 = arith.constant 0 : i32
    return %c0_i32, %c0_i32_0 : i32, i32
  }
  func.func @transform_2(%arg0: i32, %arg1: i32) -> (i32, i32) {
    %c0_i32 = arith.constant 0 : i32
    %c0_i32_0 = arith.constant 0 : i32
    %c0_i32_1 = arith.constant 0 : i32
    return %c0_i32, %c0_i32_0 : i32, i32
  }
  func.func @transform_3(%arg0: i32, %arg1: i32) -> (i32, i32) {
    %c0_i32 = arith.constant 0 : i32
    %c0_i32_0 = arith.constant 0 : i32
    return %arg0, %c0_i32 : i32, i32
  }
}

</mosaic_0001>

<bundles_post_ra>
// kernel: tpu_custom_call.1
= control target key start
LH: loop header
LB: loop body
LE: loop exit
PB: predicated region body
PF: predicated region fallthrough
CT: control target
= control target key end

     0   :  { %8 = vsyncpa [#allocation4], 0  ;;  %s291_s0 = inlined_call_operand.hbm [shape: f32[2,4,256], index: 0, kind: input, shape index: {}]   ;;  %s292_s1 = inlined_call_operand.hbm [shape: f32[4,128], index: 1, kind: input, shape index: {}]   ;;  %s293_s2 = inlined_call_operand.vmem [shape: f32[1,128], index: 2, kind: input, shape index: {}]   ;;  %s294_s3 = inlined_call_operand.hbm [shape: f32[2,128], index: 3, kind: output, shape index: {}]  }
   0x1   :  { %9 = vsyncpa [#allocation7], 0 }
   0x2   :  { %10 = vsyncpa [#allocation5], 0  ;;  %s15_s14 = sshll.u32 %s291_s0, 4  ;;  %s248_s15 = smov [#allocation3]   ;;  %s16_s14 = int_to_ptr.hbm [resolvable:$true] %s15_s14 }
   0x3   :  { %s17_s16 = sshll.u32 %s248_s15, 4  ;;  %s29_s19 = sshll.u32 %s292_s1, 4  ;;  %s18_s16 = int_to_ptr.vmem [resolvable:$true] %s17_s16  ;;  %s30_s19 = int_to_ptr.hbm [resolvable:$true] %s29_s19 }
   0x4   :  { %s249_s20 = smov 128   ;;  %s250_s21 = smov 8  }
   0x5   :  { %23 = dma.hbm_to_vmem [thread:$0]  %s16_s14, 256, %s18_s16, [#allocation4], %s249_s20, %s249_s20, %s250_s21  }
   0x6   :  { %s251_s22 = smov [#allocation6]  }
   0x7   :  { %s31_s23 = sshll.u32 %s251_s22, 4  ;;  %s32_s23 = int_to_ptr.vmem [resolvable:$true] %s31_s23 }
   0x8   :  { %34 = dma.hbm_to_vmem [thread:$0]  %s30_s19, 64, %s32_s23, [#allocation7]  }
   0x9   :  { %242 = dma.done.wait [#allocation4], 256  }
   0xa   :  { %243 = vsyncadd [#allocation4], 4294967040 }
   0xb   :  { %244 = dma.done.wait [#allocation7], 64  }
   0xc   :  { %245 = vsyncadd [#allocation7], 4294967232  ;;  %v51_v0 = vld [vmem:[#allocation3] sm:$0xff]  ;;  %v52_v1 = vld [vmem:[#allocation3 + $0x8] sm:$0xff]  ;;  %vm73_vm0 = vcmask 1043456   ;;  %vm49_vm1 = vcmask 25600   ;;  %v86_v21 = vlaneseq }
   0xd   :  { %v53_v2 = vmax.f32 %v51_v0, 1e-06  ;;  %v54_v3 = vmax.f32 %v52_v1, 1e-06  ;;  %v252_v18 = vmov 0.0   ;;  %vm90_vm2 = vcmask 1041409  }
   0xe   :  { %50 = vst.msk [vmem:[#allocation2] sm:$0x3] %vm49_vm1, %v252_v18  ;;  %v106_v19 = vld [vmem:[#allocation6] sm:$0xf]  ;;  %v87_v22 = vand.u32 127, %v86_v21  ;;  %vm111_vm3 = vcmask 31744  }
   0xf   :  { %v55_v4 = vmul.f32 %v53_v2, %v53_v2  ;;  %v56_v5 = vmul.f32 %v54_v3, %v54_v3  ;;  %157 = vmatpush.msk.msra.mxu0 %vm73_vm0, %v106_v19  ;;  %v165_v36 = vld [vmem:[%s293_s2] ss:$0 sm:$0xff]  ;;  %s253_s24 = smov [#allocation8]   ;;  %s146_s28 = sshll.u32 %s294_s3, 4  ;;  %s147_s28 = int_to_ptr.hbm [resolvable:$true] %s146_s28 }
  0x10   :  { %s144_s25 = sshll.u32 %s253_s24, 4  ;;  %s145_s25 = int_to_ptr.vmem [resolvable:$true] %s144_s25 }
  0x11   :  { %v57_v6 = vmul.f32 %v55_v4, %v53_v2  ;;  %v58_v7 = vmul.f32 %v56_v5, %v54_v3 }
  0x13   :  { %62 = vst [vmem:[#allocation1] ss:$2 sm:$0xff] %v57_v6 }
  0x14   :  { %66 = vst [vmem:[#allocation1 + $0x10] ss:$2 sm:$0xff] %v58_v7 }
  0x15   :  { %v59_v25 = vld [vmem:[#allocation2] sm:$0x3] }
  0x1a   :  { %v63_v8 = vld.sshfl [vmem:[#allocation1] sm:$0xff pattern:$0x75316420]  ;;  %v64_v9 = vld.sshfl [vmem:[#allocation1 + $0x8] sm:$0xff pattern:$0x75316420] }
  0x1b   :  { %v74_v10 = vsel %vm73_vm0, %v63_v8, 0.0  ;;  %v75_v11 = vsel %vm73_vm0, %v64_v9, 0.0  ;;  %v67_v13 = vld.sshfl [vmem:[#allocation1 + $0x10] sm:$0xff pattern:$0x75316420] }
  0x1c   :  { %v76_v12 = vadd.f32 %v75_v11, %v74_v10  ;;  %v68_v14 = vld.sshfl [vmem:[#allocation1 + $0x18] sm:$0xff pattern:$0x75316420]  ;;  %v79_v15 = vsel %vm73_vm0, %v67_v13, 0.0 }
  0x1d   :  { %v80_v16 = vsel %vm73_vm0, %v68_v14, 0.0 }
  0x1e   :  { %77 = vadd.xlane.f32.xlu0 %v76_v12  ;;  %v81_v17 = vadd.f32 %v80_v16, %v79_v15 }
  0x26   :  { %82 = vadd.xlane.f32.xlu0 %v81_v17 }
  0x91   :  { %v78_v20 = vpop.xlane.xlu0 %77 }
  0x92   :  { %v88_v24 = vperm.slane %v78_v20, %v87_v22 }
  0x99   :  { %v83_v23 = vpop.xlane.xlu0 %82 }
  0x9a   :  { %v89_v26 = vperm.slane %v83_v23, %v87_v22 }
  0x9c   :  { %v91_v27 = vsel %vm90_vm2, %v89_v26, %v88_v24 }
  0x9d   :  { %v93_v28 = vadd.f32 %v91_v27, %v59_v25 }
  0x9f   :  { %95 = vst.msk [vmem:[#allocation2] sm:$0x3] %vm49_vm1, %v93_v28 }
  0xa6   :  { %v99_v29 = vld [vmem:[#allocation2] sm:$0x3] }
  0xa7   :  { %v100_v30 = vmul.f32 0.00390625, %v99_v29 }
  0xa9   :  { %166 = vlog2.f32 %v100_v30 }
  0xaf   :  { %v167_v31 = vpop.eup %166 }
  0xb0   :  { %v102_v32 = vmul.f32 0.6931472, %v167_v31 }
  0xb2   :  { %v103_v33 = vmul.f32 0.33333334, %v102_v32 }
  0xb4   :  { %v104_v34 = vmul.f32 1.442695, %v103_v33 }
  0xb6   :  { %168 = vpow2.f32 %v104_v34 }
  0xbc   :  { %v169_v35 = vpop.eup %168 }
  0xbd   :  { %158 = vmatmul.msk.f32.vlgmr.msra.gmra.mxu0 %vm111_vm3, %v169_v35 }
 0x13a   :  { %v135_v37 = vpop.f32.mrf.mxu0 }
 0x13b   :  { %v136_v38 = vadd.f32 %v165_v36, %v135_v37 }
 0x13d   :  { %138 = vst [vmem:[#allocation8] sm:$0x3] %v136_v38 }
 0x13e   :  { %149 = dma.vmem_to_hbm [thread:$0]  %s145_s25, 32, %s147_s28, [#allocation5]  }
 0x13f   :  { %246 = dma.done.wait [#allocation5], 32  }
 0x140   :  { %247 = vsyncadd [#allocation5], 4294967264 }
 0x141   :  { %154 = vsyncpa [#allocation4], 1 }
 0x142   :  { %155 = vsyncpa [#allocation7], 1 }
 0x143   :  { %156 = vsyncpa [#allocation5], 1 }

</bundles_post_ra>
